<compile_context>
chip_gen: v6e
topology: v6e:2x2x1
jax: 0.10.0
libtpu: 0.0.40
codegen_flags: <defaults>
</compile_context>

<pallas_src>
import functools

import jax
import jax.numpy as jnp
from jax.experimental import pallas as pl
from jax.experimental.pallas import tpu as pltpu


def _round_up(n, m):
    return ((n + m - 1) // m) * m


def _choose_batch_tile(batch):
    # TB=256: large enough to amortize the ~0.35us/grid-step overhead, small
    # enough that the live (TB,512)/(TB,384) intermediates don't spill hard
    # (review: TB=512 spills >10x the vreg file).  Mid-size batches use 128 so
    # the grid still has >=2 steps for double-buffering / v7x TC sharding.
    if batch >= 512:
        return 256
    if batch >= 128:
        return 128
    # Tiny-batch path: dominated by launch + one-shot weight DMA; one small tile.
    return _round_up(batch, 8)


def _actor_kernel(x_ref, w1_ref, w2_ref, w3_ref, o_ref, *, scale):
    """One batch tile of relu(L1) -> relu(L2) -> tanh(L3) -> (t+1)/2*max_action.

    Biases are pre-folded into the (bf16) weights via the constant-1.0 column
    of x and carrier columns, so each hidden layer's epilogue is just a ReLU
    on bf16 values; the final tanh + affine runs in f32 (tanh rides the EUP).
    """
    # layer_1 (+ folded b1) + ReLU        -> (TB, 512) bf16
    h1 = jnp.dot(x_ref[...], w1_ref[...], preferred_element_type=jnp.float32)
    h1 = jnp.maximum(h1.astype(jnp.bfloat16), 0.0)

    # layer_2 (+ folded b2) + ReLU        -> (TB, 384) bf16
    h2 = jnp.dot(h1, w2_ref[...], preferred_element_type=jnp.float32)
    h2 = jnp.maximum(h2.astype(jnp.bfloat16), 0.0)

    # layer_3 (+ folded b3) + tanh        -> (TB, A) f32
    h3 = jnp.dot(h2, w3_ref[...], preferred_element_type=jnp.float32)
    t = jnp.tanh(h3)

    # (tanh + 1)/2 * max_action == tanh*scale + scale,  scale = max_action/2
    o_ref[...] = (t * scale + scale).astype(o_ref.dtype)


def init_actor_params(key, state_dim, action_dim):
    """PyTorch nn.Linear-style uniform init; weights stored as (in, out), f32."""
    ks = jax.random.split(key, 6)

    def linear(kw, kb, fan_in, fan_out):
        bound = 1.0 / jnp.sqrt(fan_in)
        w = jax.random.uniform(kw, (fan_in, fan_out), jnp.float32, -bound, bound)
        b = jax.random.uniform(kb, (fan_out,), jnp.float32, -bound, bound)
        return w, b

    w1, b1 = linear(ks[0], ks[1], state_dim, 400)
    w2, b2 = linear(ks[2], ks[3], 400, 300)
    w3, b3 = linear(ks[4], ks[5], 300, action_dim)
    return {"w1": w1, "b1": b1, "w2": w2, "b2": b2, "w3": w3, "b3": b3}


def prepare_actor_params(params):
    """One-time weight prep:

      * dims zero-padded to lane multiples of 128 (state->128, 400->512,
        300->384), leaving one spare column per layer,
      * biases folded into the weights: row S of w1p (driven by x's appended
        1.0 column) carries b1 and a 1.0 carrier into column H1; the post-ReLU
        1.0 there drives row H1 of w2p (= b2) and another carrier for b3,
      * weights cast to bf16 for the bf16-native MXU (f32 accumulation).
    """
    w1, b1 = params["w1"], params["b1"]
    w2, b2 = params["w2"], params["b2"]
    w3, b3 = params["w3"], params["b3"]

    S, H1 = w1.shape
    H2 = w2.shape[1]
    A = w3.shape[1]
    Sp = _round_up(S + 1, 128)      # room for the constant-1.0 input column
    H1p = _round_up(H1 + 1, 128)    # room for the layer-2 bias carrier
    H2p = _round_up(H2 + 1, 128)    # room for the layer-3 bias carrier

    w1p = jnp.zeros((Sp, H1p), jnp.float32)
    w1p = w1p.at[:S, :H1].set(w1)
    w1p = w1p.at[S, :H1].set(b1)      # b1, driven by x's ones column
    w1p = w1p.at[S, H1].set(1.0)      # carrier -> h1[:, H1] == 1.0
    w1p = w1p.astype(jnp.bfloat16)

    w2p = jnp.zeros((H1p, H2p), jnp.float32)
    w2p = w2p.at[:H1, :H2].set(w2)
    w2p = w2p.at[H1, :H2].set(b2)     # b2, driven by h1's carrier column
    w2p = w2p.at[H1, H2].set(1.0)     # carrier -> h2[:, H2] == 1.0
    w2p = w2p.astype(jnp.bfloat16)

    w3p = jnp.zeros((H2p, A), jnp.float32)
    w3p = w3p.at[:H2, :].set(w3)
    w3p = w3p.at[H2, :].set(b3)       # b3, driven by h2's carrier column
    w3p = w3p.astype(jnp.bfloat16)

    return {"w1": w1p, "w2": w2p, "w3": w3p,
            "dims": (S, H1, H2, A, Sp, H1p, H2p)}


def actor_forward(x, prepared, max_action):
    """x: (B, state_dim) float32 -> (B, action_dim) float32."""
    S, H1, H2, A, Sp, H1p, H2p = prepared["dims"]
    w1p, w2p, w3p = prepared["w1"], prepared["w2"], prepared["w3"]

    B = x.shape[0]
    TB = _choose_batch_tile(B)
    B_pad = pl.cdiv(B, TB) * TB
    grid = (B_pad // TB,)

    # Bias-augmented, lane-dense, bf16 input: [x | 1.0 | 0 ... 0], batch-padded
    # to an exact multiple of TB (no ragged blocks).
    x_aug = jnp.zeros((B_pad, Sp), jnp.bfloat16)
    x_aug = x_aug.at[:B, :S].set(x.astype(jnp.bfloat16))
    x_aug = x_aug.at[:, S].set(1.0)

    kernel = functools.partial(_actor_kernel, scale=float(max_action) * 0.5)

    weight_bytes = (w1p.size + w2p.size + w3p.size) * 2
    cost = pl.CostEstimate(
        flops=2 * B_pad * (Sp * H1p + H1p * H2p + H2p * A),
        transcendentals=B_pad * A,
        bytes_accessed=weight_bytes + B_pad * Sp * 2 + B_pad * A * 4,
    )

    out = pl.pallas_call(
        kernel,
        out_shape=jax.ShapeDtypeStruct((B_pad, A), jnp.float32),
        grid=grid,
        in_specs=[
            pl.BlockSpec((TB, Sp), lambda i: (i, 0)),        # x streams
            pl.BlockSpec((Sp, H1p), lambda i: (0, 0)),       # VMEM-resident
            pl.BlockSpec((H1p, H2p), lambda i: (0, 0)),      # VMEM-resident
            pl.BlockSpec((H2p, A), lambda i: (0, 0)),        # VMEM-resident
        ],
        out_specs=pl.BlockSpec((TB, A), lambda i: (i, 0)),   # no lane-padding write
        compiler_params=pltpu.CompilerParams(
            dimension_semantics=("parallel",)),
        cost_estimate=cost,
    )(x_aug, w1p, w2p, w3p)

    return out if B_pad == B else out[:B]


if __name__ == "__main__":
    state_dim = 32
    action_dim = 8
    batch = 2
    max_action = 2.0

    key = jax.random.PRNGKey(0)
    k_params, k_x = jax.random.split(key)

    params = init_actor_params(k_params, state_dim, action_dim)
    prepared = prepare_actor_params(params)
    x = jax.random.normal(k_x, (batch, state_dim), dtype=jnp.float32)

    out = actor_forward(x, prepared, max_action)
    out = jax.block_until_ready(out)

    # Pure-JAX f32 reference of the PyTorch forward:
    #   relu(L1) -> relu(L2) -> tanh(L3) -> (x+1)/2 * max_action
    h = jnp.maximum(x @ params["w1"] + params["b1"], 0.0)
    h = jnp.maximum(h @ params["w2"] + params["b2"], 0.0)
    ref = (jnp.tanh(h @ params["w3"] + params["b3"]) + 1.0) / 2.0 * max_action

    assert out.shape == (batch, action_dim)
    # Tolerance: weights, activations and folded biases feed the MXU as bf16.
    assert jnp.allclose(out, ref, atol=5e-2, rtol=5e-2)
    print("KERNEL_OK")
</pallas_src>

<mosaic_0001>
module attributes {stable_mosaic.version = 11 : i64} {
  func.func @_actor_kernel(%arg0: i32, %arg1: memref<8x128xbf16, #tpu.memory_space<vmem>>, %arg2: memref<128x512xbf16, #tpu.memory_space<vmem>>, %arg3: memref<512x384xbf16, #tpu.memory_space<vmem>>, %arg4: memref<384x8xbf16, #tpu.memory_space<vmem>>, %arg5: memref<8x8xf32, #tpu.memory_space<vmem>>) attributes {dimension_semantics = [#tpu.dimension_semantics<parallel>], iteration_bounds = array<i64: 1>, scalar_prefetch = 0 : i64, scratch_operands = 0 : i64, tpu.core_type = #tpu.core_type<tc>, window_params = [{transform_indices = @transform_0, window_bounds = array<i64: 8, 128>}, {pipeline_mode = #tpu.pipeline_mode<synchronous>, transform_indices = @transform_1, window_bounds = array<i64: 128, 512>}, {pipeline_mode = #tpu.pipeline_mode<synchronous>, transform_indices = @transform_2, window_bounds = array<i64: 512, 384>}, {pipeline_mode = #tpu.pipeline_mode<synchronous>, transform_indices = @transform_3, window_bounds = array<i64: 384, 8>}, {transform_indices = @transform_4, window_bounds = array<i64: 8, 8>}]} {
    %c0 = arith.constant 0 : index
    %c0_0 = arith.constant 0 : index
    %0 = vector.load %arg1[%c0, %c0_0] : memref<8x128xbf16, #tpu.memory_space<vmem>>, vector<8x128xbf16>
    %c0_1 = arith.constant 0 : index
    %c0_2 = arith.constant 0 : index
    %1 = vector.load %arg2[%c0_1, %c0_2] : memref<128x512xbf16, #tpu.memory_space<vmem>>, vector<128x512xbf16>
    %cst = arith.constant dense<0.000000e+00> : vector<8x512xf32>
    %2 = tpu.matmul %0, %1, %cst {dimension_numbers = #tpu.dot_dimension_numbers<[1], [0], [0], [1], [0, 0, 1, 1], [], []>} : vector<8x128xbf16>, vector<128x512xbf16>, vector<8x512xf32> -> vector<8x512xf32>
    %3 = arith.truncf %2 : vector<8x512xf32> to vector<8x512xbf16>
    %cst_3 = arith.constant 0.000000e+00 : bf16
    %4 = vector.broadcast %cst_3 : bf16 to vector<8x512xbf16>
    %5 = arith.maximumf %3, %4 : vector<8x512xbf16>
    %c0_4 = arith.constant 0 : index
    %c0_5 = arith.constant 0 : index
    %6 = vector.load %arg3[%c0_4, %c0_5] : memref<512x384xbf16, #tpu.memory_space<vmem>>, vector<512x384xbf16>
    %cst_6 = arith.constant dense<0.000000e+00> : vector<8x384xf32>
    %7 = tpu.matmul %5, %6, %cst_6 {dimension_numbers = #tpu.dot_dimension_numbers<[1], [0], [0], [1], [0, 0, 1, 1], [], []>} : vector<8x512xbf16>, vector<512x384xbf16>, vector<8x384xf32> -> vector<8x384xf32>
    %8 = arith.truncf %7 : vector<8x384xf32> to vector<8x384xbf16>
    %cst_7 = arith.constant 0.000000e+00 : bf16
    %9 = vector.broadcast %cst_7 : bf16 to vector<8x384xbf16>
    %10 = arith.maximumf %8, %9 : vector<8x384xbf16>
    %c0_8 = arith.constant 0 : index
    %c0_9 = arith.constant 0 : index
    %11 = vector.load %arg4[%c0_8, %c0_9] : memref<384x8xbf16, #tpu.memory_space<vmem>>, vector<384x8xbf16>
    %cst_10 = arith.constant dense<0.000000e+00> : vector<8x8xf32>
    %12 = tpu.matmul %10, %11, %cst_10 {dimension_numbers = #tpu.dot_dimension_numbers<[1], [0], [0], [1], [0, 0, 1, 1], [], []>} : vector<8x384xbf16>, vector<384x8xbf16>, vector<8x8xf32> -> vector<8x8xf32>
    %13 = math.tanh %12 : vector<8x8xf32>
    %cst_11 = arith.constant 1.000000e+00 : f32
    %14 = vector.broadcast %cst_11 : f32 to vector<8x8xf32>
    %15 = arith.mulf %13, %14 : vector<8x8xf32>
    %cst_12 = arith.constant 1.000000e+00 : f32
    %16 = vector.broadcast %cst_12 : f32 to vector<8x8xf32>
    %17 = arith.addf %15, %16 : vector<8x8xf32>
    %c0_13 = arith.constant 0 : index
    %c0_14 = arith.constant 0 : index
    %18 = vector.load %arg5[%c0_13, %c0_14] : memref<8x8xf32, #tpu.memory_space<vmem>>, vector<8x8xf32>
    tpu.vector_store %arg5[%c0_13, %c0_14], %17 {strides = array<i32>} : memref<8x8xf32, #tpu.memory_space<vmem>>, vector<8x8xf32>,
    return
  }
  func.func @transform_0(%arg0: i32) -> (i32, i32) {
    %c0_i32 = arith.constant 0 : i32
    %c0_i32_0 = arith.constant 0 : i32
    return %arg0, %c0_i32 : i32, i32
  }
  func.func @transform_1(%arg0: i32) -> (i32, i32) {
    %c0_i32 = arith.constant 0 : i32
    %c0_i32_0 = arith.constant 0 : i32
    %c0_i32_1 = arith.constant 0 : i32
    return %c0_i32, %c0_i32_0 : i32, i32
  }
  func.func @transform_2(%arg0: i32) -> (i32, i32) {
    %c0_i32 = arith.constant 0 : i32
    %c0_i32_0 = arith.constant 0 : i32
    %c0_i32_1 = arith.constant 0 : i32
    return %c0_i32, %c0_i32_0 : i32, i32
  }
  func.func @transform_3(%arg0: i32) -> (i32, i32) {
    %c0_i32 = arith.constant 0 : i32
    %c0_i32_0 = arith.constant 0 : i32
    %c0_i32_1 = arith.constant 0 : i32
    return %c0_i32, %c0_i32_0 : i32, i32
  }
  func.func @transform_4(%arg0: i32) -> (i32, i32) {
    %c0_i32 = arith.constant 0 : i32
    %c0_i32_0 = arith.constant 0 : i32
    return %arg0, %c0_i32 : i32, i32
  }
}

</mosaic_0001>

<bundles_post_ra>
// kernel: tpu_custom_call.1
= control target key start
LH: loop header
LB: loop body
LE: loop exit
PB: predicated region body
PF: predicated region fallthrough
CT: control target
= control target key end

     0   :  { %9 = vsyncpa [#allocation3], 0  ;;  %s2091_s0 = inlined_call_operand.vmem [shape: bf16[8,128], index: 0, kind: input, shape index: {}]   ;;  %s2092_s1 = inlined_call_operand.hbm [shape: bf16[128,512], index: 1, kind: input, shape index: {}]   ;;  %s2093_s2 = inlined_call_operand.hbm [shape: bf16[512,384], index: 2, kind: input, shape index: {}]   ;;  %s2094_s3 = inlined_call_operand.vmem [shape: bf16[384,8], index: 3, kind: input, shape index: {}]   ;;  %s2095_s4 = inlined_call_operand.hbm [shape: f32[8,8], index: 4, kind: output, shape index: {}]  }
   0x1   :  { %10 = vsyncpa [#allocation6], 0 }
   0x2   :  { %11 = vsyncpa [#allocation4], 0  ;;  %s1955_s15 = smov [#allocation2]  }
   0x3   :  { %s19_s16 = sshll.u32 %s1955_s15, 4  ;;  %s20_s16 = int_to_ptr.vmem [resolvable:$true] %s19_s16 }
   0x4   :  { %s1897_s17 = scalar_lea.vmem %s20_s16, 4096  ;;  %p1902_p1 = scmp.lt.s32.totalorder %s20_s16, %s20_s16 }
   0x5   :  { %p1898_p0 = scmp.ne.s32.totalorder %s20_s16, %s1897_s17  ;;  %p1903_p2 = scmp.lt.s32.totalorder %s1897_s17, %s1897_s17 }
   0x7   :  { %p1904_p3 = por %p1903_p2, %p1902_p1 }
   0x9   :  { %p1905_p4 = pnand %p1904_p3, %p1898_p0 }
   0xb   :  { %1908 = shalt.err (!%p1905_p4)
}
   0xc   :  { %s1956_s18 = smov 256   ;;  %s1957_s19 = smov 16  }
   0xd   :  { %25 = dma.hbm_to_vmem [thread:$0]  %s2092_s1, 4096, %s20_s16, [#allocation3], %s1956_s18, %s1956_s18, %s1957_s19  }
   0xe   :  { %s1958_s22 = smov [#allocation5]  }
   0xf   :  { %s31_s23 = sshll.u32 %s1958_s22, 4  ;;  %s32_s23 = int_to_ptr.vmem [resolvable:$true] %s31_s23 }
  0x10   :  { %s1917_s24 = scalar_lea.vmem %s32_s23, 12288  ;;  %p1922_p6 = scmp.lt.s32.totalorder %s32_s23, %s32_s23 }
  0x11   :  { %p1918_p5 = scmp.ne.s32.totalorder %s32_s23, %s1917_s24  ;;  %p1923_p7 = scmp.lt.s32.totalorder %s1917_s24, %s1917_s24 }
  0x13   :  { %p1924_p8 = por %p1923_p7, %p1922_p6 }
  0x15   :  { %p1925_p9 = pnand %p1924_p8, %p1918_p5 }
  0x17   :  { %1928 = shalt.err (!%p1925_p9)
}
  0x18   :  { %s1959_s25 = smov 192   ;;  %s1960_s26 = smov 12  }
  0x19   :  { %37 = dma.hbm_to_vmem [thread:$0]  %s2093_s2, 12288, %s32_s23, [#allocation6], %s1959_s25, %s1959_s25, %s1960_s26  }
  0x1a   :  { %1949 = dma.done.wait [#allocation3], 4096  }
  0x1b   :  { %1950 = vsyncadd [#allocation3], 4294963200 }
  0x1c   :  { %1951 = dma.done.wait [#allocation6], 12288  }
  0x1d   :  { %1952 = vsyncadd [#allocation6], 4294955008  ;;  %v1961_v0 = vmov 0   ;;  %v1687_v1 = vld [vmem:[#allocation2 + $0xe4] ss:$16 sps:$4 sm:$0xff]   ;;  %vm1963_vm0 = vmmov 0  }
  0x1e   :  { %272 = vmatprep.mubr.bf16.mxu0 %v1961_v0  ;;  %313 = vmatprep.mubr.bf16.mxu1 %v1961_v0  ;;  %v1689_v2 = vld [vmem:[#allocation2 + $0xec] ss:$16 sps:$4 sm:$0xff]   ;;  %v1691_v3 = vld [vmem:[#allocation2 + $0xe0] ss:$16 sps:$4 sm:$0xff]   ;;  %v1692_v4 = vld [vmem:[#allocation2 + $0xe8] ss:$16 sps:$4 sm:$0xff]  }
  0x1f   :  { %240 = vmatprep.subr.bf16.mxu0 %v1687_v1  ;;  %281 = vmatprep.subr.bf16.mxu1 %v1689_v2  ;;  %v1693_v5 = vld [vmem:[#allocation2 + $0xc4] ss:$16 sps:$4 sm:$0xff]   ;;  %v1695_v6 = vld [vmem:[#allocation2 + $0xcc] ss:$16 sps:$4 sm:$0xff]   ;;  %v1697_v7 = vld [vmem:[#allocation2 + $0xc0] ss:$16 sps:$4 sm:$0xff]  }
  0x20   :  { %241 = vmatpush1.bf16.msra.mxu0 %v1691_v3  ;;  %282 = vmatpush1.bf16.msra.mxu1 %v1692_v4  ;;  %v1698_v8 = vld [vmem:[#allocation2 + $0xc8] ss:$16 sps:$4 sm:$0xff]   ;;  %v1699_v9 = vld [vmem:[#allocation2 + $0xa4] ss:$16 sps:$4 sm:$0xff]   ;;  %v1701_v10 = vld [vmem:[#allocation2 + $0xac] ss:$16 sps:$4 sm:$0xff]  }
  0x21   :  { %242 = vmatprep.subr.bf16.mxu0 %v1693_v5  ;;  %283 = vmatprep.subr.bf16.mxu1 %v1695_v6  ;;  %v1703_v11 = vld [vmem:[#allocation2 + $0xa0] ss:$16 sps:$4 sm:$0xff]   ;;  %v1704_v12 = vld [vmem:[#allocation2 + $0xa8] ss:$16 sps:$4 sm:$0xff]   ;;  %v1705_v13 = vld [vmem:[#allocation2 + $0x84] ss:$16 sps:$4 sm:$0xff]  }
  0x22   :  { %v1707_v14 = vld [vmem:[#allocation2 + $0x8c] ss:$16 sps:$4 sm:$0xff]   ;;  %v1709_v15 = vld [vmem:[#allocation2 + $0x80] ss:$16 sps:$4 sm:$0xff]   ;;  %v1710_v16 = vld [vmem:[#allocation2 + $0x88] ss:$16 sps:$4 sm:$0xff]  }
  0x23   :  { %v1711_v17 = vld [vmem:[#allocation2 + $0x64] ss:$16 sps:$4 sm:$0xff]   ;;  %v1713_v18 = vld [vmem:[#allocation2 + $0x6c] ss:$16 sps:$4 sm:$0xff]   ;;  %v1715_v19 = vld [vmem:[#allocation2 + $0x60] ss:$16 sps:$4 sm:$0xff]  }
  0x24   :  { %243 = vmatpush1.bf16.msra.mxu0 %v1697_v7  ;;  %284 = vmatpush1.bf16.msra.mxu1 %v1698_v8  ;;  %v1716_v20 = vld [vmem:[#allocation2 + $0x68] ss:$16 sps:$4 sm:$0xff]   ;;  %v1717_v21 = vld [vmem:[#allocation2 + $0x44] ss:$16 sps:$4 sm:$0xff]   ;;  %v1719_v22 = vld [vmem:[#allocation2 + $0x4c] ss:$16 sps:$4 sm:$0xff]  }
  0x25   :  { %244 = vmatprep.subr.bf16.mxu0 %v1699_v9  ;;  %285 = vmatprep.subr.bf16.mxu1 %v1701_v10  ;;  %v1721_v23 = vld [vmem:[#allocation2 + $0x40] ss:$16 sps:$4 sm:$0xff]   ;;  %v1722_v24 = vld [vmem:[#allocation2 + $0x48] ss:$16 sps:$4 sm:$0xff]   ;;  %v1723_v25 = vld [vmem:[#allocation2 + $0x24] ss:$16 sps:$4 sm:$0xff]  }
  0x26   :  { %v1725_v26 = vld [vmem:[#allocation2 + $0x2c] ss:$16 sps:$4 sm:$0xff]   ;;  %v1727_v27 = vld [vmem:[#allocation2 + $0x20] ss:$16 sps:$4 sm:$0xff]   ;;  %v1728_v28 = vld [vmem:[#allocation2 + $0x28] ss:$16 sps:$4 sm:$0xff]  }
  0x27   :  { %v1729_v29 = vld [vmem:[#allocation2 + $0x4] ss:$16 sps:$4 sm:$0xff]   ;;  %v1731_v30 = vld [vmem:[#allocation2 + $0xc] ss:$16 sps:$4 sm:$0xff]   ;;  %v1733_v31 = vld [vmem:[#allocation2] ss:$16 sps:$4 sm:$0xff]  }
  0x28   :  { %245 = vmatpush1.bf16.msra.mxu0 %v1703_v11  ;;  %286 = vmatpush1.bf16.msra.mxu1 %v1704_v12  ;;  %v1734_v32 = vld [vmem:[#allocation2 + $0x8] ss:$16 sps:$4 sm:$0xff]   ;;  %v47_v35 = vld [vmem:[%s2091_s0] sm:$0xf]  ;;  %v1741_v40 = vld [vmem:[#allocation5 + $0x90] ss:$12 sps:$4 sm:$0xff]  }
  0x29   :  { %246 = vmatprep.subr.bf16.mxu0 %v1705_v13  ;;  %287 = vmatprep.subr.bf16.mxu1 %v1707_v14  ;;  %v1737_v33 = vld [vmem:[#allocation5 + $0xac] ss:$12 sps:$4 sm:$0xff]   ;;  %v1735_v36 = vld [vmem:[#allocation5 + $0xa8] ss:$12 sps:$4 sm:$0xff]   ;;  %v1744_v41 = vld [vmem:[#allocation5 + $0x210] ss:$12 sps:$4 sm:$0xff]  }
  0x2a   :  { %v1740_v34 = vld [vmem:[#allocation5 + $0x22c] ss:$12 sps:$4 sm:$0xff]   ;;  %v1738_v37 = vld [vmem:[#allocation5 + $0x228] ss:$12 sps:$4 sm:$0xff]   ;;  %v1755_v46 = vld [vmem:[#allocation5 + $0x64] ss:$12 sps:$4 sm:$0xff]  }
  0x2b   :  { %v1743_v38 = vld [vmem:[#allocation5 + $0x94] ss:$12 sps:$4 sm:$0xff]   ;;  %v1749_v42 = vld [vmem:[#allocation5 + $0x7c] ss:$12 sps:$4 sm:$0xff]   ;;  %v1747_v44 = vld [vmem:[#allocation5 + $0x78] ss:$12 sps:$4 sm:$0xff]  }
  0x2c   :  { %247 = vmatpush1.bf16.msra.mxu0 %v1709_v15  ;;  %288 = vmatpush1.bf16.msra.mxu1 %v1710_v16  ;;  %v1746_v39 = vld [vmem:[#allocation5 + $0x214] ss:$12 sps:$4 sm:$0xff]   ;;  %v1752_v43 = vld [vmem:[#allocation5 + $0x1fc] ss:$12 sps:$4 sm:$0xff]   ;;  %v1750_v45 = vld [vmem:[#allocation5 + $0x1f8] ss:$12 sps:$4 sm:$0xff]  }
  0x2d   :  { %248 = vmatprep.subr.bf16.mxu0 %v1711_v17  ;;  %289 = vmatprep.subr.bf16.mxu1 %v1713_v18  ;;  %v1758_v47 = vld [vmem:[#allocation5 + $0x1e4] ss:$12 sps:$4 sm:$0xff]   ;;  %v1753_v48 = vld [vmem:[#allocation5 + $0x60] ss:$12 sps:$4 sm:$0xff]   ;;  %v1759_v52 = vld [vmem:[#allocation5 + $0x48] ss:$12 sps:$4 sm:$0xff]  }
  0x2e   :  { %v1756_v49 = vld [vmem:[#allocation5 + $0x1e0] ss:$12 sps:$4 sm:$0xff]   ;;  %v1762_v53 = vld [vmem:[#allocation5 + $0x1c8] ss:$12 sps:$4 sm:$0xff]   ;;  %v1765_v56 = vld [vmem:[#allocation5 + $0x30] ss:$12 sps:$4 sm:$0xff]  }
  0x2f   :  { %v1761_v50 = vld [vmem:[#allocation5 + $0x4c] ss:$12 sps:$4 sm:$0xff]   ;;  %v1767_v54 = vld [vmem:[#allocation5 + $0x34] ss:$12 sps:$4 sm:$0xff]   ;;  %v1768_v57 = vld [vmem:[#allocation5 + $0x1b0] ss:$12 sps:$4 sm:$0xff]  }
  0x30   :  { %249 = vmatpush1.bf16.msra.mxu0 %v1715_v19  ;;  %290 = vmatpush1.bf16.msra.mxu1 %v1716_v20  ;;  %v1764_v51 = vld [vmem:[#allocation5 + $0x1cc] ss:$12 sps:$4 sm:$0xff]   ;;  %v1770_v55 = vld [vmem:[#allocation5 + $0x1b4] ss:$12 sps:$4 sm:$0xff]   ;;  %v1773_v58 = vld [vmem:[#allocation5 + $0x1c] ss:$12 sps:$4 sm:$0xff]  }
  0x31   :  { %250 = vmatprep.subr.bf16.mxu0 %v1717_v21  ;;  %291 = vmatprep.subr.bf16.mxu1 %v1719_v22  ;;  %v1776_v59 = vld [vmem:[#allocation5 + $0x19c] ss:$12 sps:$4 sm:$0xff]   ;;  %v1771_v60 = vld [vmem:[#allocation5 + $0x18] ss:$12 sps:$4 sm:$0xff]   ;;  %v1777_v1 = vld [vmem:[#allocation5] ss:$12 sps:$4 sm:$0xff]  }
  0x32   :  { %v1774_v61 = vld [vmem:[#allocation5 + $0x198] ss:$12 sps:$4 sm:$0xff]   ;;  %v1780_v2 = vld [vmem:[#allocation5 + $0x180] ss:$12 sps:$4 sm:$0xff]   ;;  %v1783_v5 = vld [vmem:[#allocation5 + $0x168] ss:$12 sps:$4 sm:$0xff]  }
  0x33   :  { %v1779_v62 = vld [vmem:[#allocation5 + $0x4] ss:$12 sps:$4 sm:$0xff]   ;;  %v1785_v3 = vld [vmem:[#allocation5 + $0x16c] ss:$12 sps:$4 sm:$0xff]   ;;  %v1786_v6 = vld [vmem:[#allocation5 + $0x2e8] ss:$12 sps:$4 sm:$0xff]  }
  0x34   :  { %251 = vmatpush1.bf16.msra.mxu0 %v1721_v23  ;;  %292 = vmatpush1.bf16.msra.mxu1 %v1722_v24  ;;  %v1782_v63 = vld [vmem:[#allocation5 + $0x184] ss:$12 sps:$4 sm:$0xff]   ;;  %v1788_v4 = vld [vmem:[#allocation5 + $0x2ec] ss:$12 sps:$4 sm:$0xff]   ;;  %v1791_v7 = vld [vmem:[#allocation5 + $0x154] ss:$12 sps:$4 sm:$0xff]  }
  0x35   :  { %252 = vmatprep.subr.bf16.mxu0 %v1723_v25  ;;  %293 = vmatprep.subr.bf16.mxu1 %v1725_v26  ;;  %v1794_v8 = vld [vmem:[#allocation5 + $0x2d4] ss:$12 sps:$4 sm:$0xff]   ;;  %v1789_v9 = vld [vmem:[#allocation5 + $0x150] ss:$12 sps:$4 sm:$0xff]   ;;  %v1795_v13 = vld [vmem:[#allocation5 + $0x138] ss:$12 sps:$4 sm:$0xff]  }
  0x36   :  { %v1792_v10 = vld [vmem:[#allocation5 + $0x2d0] ss:$12 sps:$4 sm:$0xff]   ;;  %v1798_v14 = vld [vmem:[#allocation5 + $0x2b8] ss:$12 sps:$4 sm:$0xff]   ;;  %v1801_v17 = vld [vmem:[#allocation5 + $0x120] ss:$12 sps:$4 sm:$0xff]  }
  0x37   :  { %v1797_v11 = vld [vmem:[#allocation5 + $0x13c] ss:$12 sps:$4 sm:$0xff]   ;;  %v1803_v15 = vld [vmem:[#allocation5 + $0x124] ss:$12 sps:$4 sm:$0xff]   ;;  %v1804_v18 = vld [vmem:[#allocation5 + $0x2a0] ss:$12 sps:$4 sm:$0xff]  }
  0x38   :  { %253 = vmatpush1.bf16.msra.mxu0 %v1727_v27  ;;  %294 = vmatpush1.bf16.msra.mxu1 %v1728_v28  ;;  %v1800_v12 = vld [vmem:[#allocation5 + $0x2bc] ss:$12 sps:$4 sm:$0xff]   ;;  %v1806_v16 = vld [vmem:[#allocation5 + $0x2a4] ss:$12 sps:$4 sm:$0xff]   ;;  %v1809_v19 = vld [vmem:[#allocation5 + $0x10c] ss:$12 sps:$4 sm:$0xff]  }
  0x39   :  { %254 = vmatprep.subr.bf16.mxu0 %v1729_v29  ;;  %295 = vmatprep.subr.bf16.mxu1 %v1731_v30  ;;  %v1812_v20 = vld [vmem:[#allocation5 + $0x28c] ss:$12 sps:$4 sm:$0xff]   ;;  %v1807_v21 = vld [vmem:[#allocation5 + $0x108] ss:$12 sps:$4 sm:$0xff]   ;;  %v1813_v25 = vld [vmem:[#allocation5 + $0xf0] ss:$12 sps:$4 sm:$0xff]  }
  0x3a   :  { %v1810_v22 = vld [vmem:[#allocation5 + $0x288] ss:$12 sps:$4 sm:$0xff]   ;;  %v1816_v26 = vld [vmem:[#allocation5 + $0x270] ss:$12 sps:$4 sm:$0xff]   ;;  %v1819_v29 = vld [vmem:[#allocation5 + $0xd8] ss:$12 sps:$4 sm:$0xff]  }
  0x3b   :  { %v1815_v23 = vld [vmem:[#allocation5 + $0xf4] ss:$12 sps:$4 sm:$0xff]   ;;  %v1821_v27 = vld [vmem:[#allocation5 + $0xdc] ss:$12 sps:$4 sm:$0xff]   ;;  %v1822_v30 = vld [vmem:[#allocation5 + $0x258] ss:$12 sps:$4 sm:$0xff]  }
  0x3c   :  { %255 = vmatpush1.bf16.msra.mxu0 %v1733_v31  ;;  %296 = vmatpush1.bf16.msra.mxu1 %v1734_v32  ;;  %v1818_v24 = vld [vmem:[#allocation5 + $0x274] ss:$12 sps:$4 sm:$0xff]   ;;  %v1824_v28 = vld [vmem:[#allocation5 + $0x25c] ss:$12 sps:$4 sm:$0xff]   ;;  %v1827_v31 = vld [vmem:[#allocation5 + $0xc4] ss:$12 sps:$4 sm:$0xff]  }
  0x3d   :  { %970 = vmatprep.subr.bf16.mxu0 %v1737_v33  ;;  %1011 = vmatprep.subr.bf16.mxu1 %v1740_v34  ;;  %v1830_v32 = vld [vmem:[#allocation5 + $0x244] ss:$12 sps:$4 sm:$0xff]   ;;  %v1825_v33 = vld [vmem:[#allocation5 + $0xc0] ss:$12 sps:$4 sm:$0xff]   ;;  %vm1412_vm1 = vcmask 64512  }
  0x3e   :  { %v1828_v34 = vld [vmem:[#allocation5 + $0x240] ss:$12 sps:$4 sm:$0xff]  }
  0x3f   :  { %273 = vmatmul.mubr.bf16.vlgmr.msra.gmra.mxu0 %v47_v35  ;;  %314 = vmatmul.mubr.bf16.vlgmr.msra.gmra.mxu1 %v47_v35  ;;  %v1831_v35 = vld [vmem:[#allocation5 + $0x170] ss:$12 sps:$4 sm:$0xff]  }
  0x40   :  { %971 = vmatpush1.bf16.msra.mxu0 %v1735_v36  ;;  %1012 = vmatpush1.bf16.msra.mxu1 %v1738_v37  ;;  %v1832_v36 = vld [vmem:[#allocation5 + $0x2f0] ss:$12 sps:$4 sm:$0xff]  }
  0x41   :  { %972 = vmatprep.subr.bf16.mxu0 %v1743_v38  ;;  %1013 = vmatprep.subr.bf16.mxu1 %v1746_v39 }
  0x44   :  { %973 = vmatpush1.bf16.msra.mxu0 %v1741_v40  ;;  %1014 = vmatpush1.bf16.msra.mxu1 %v1744_v41 }
  0x45   :  { %974 = vmatprep.subr.bf16.mxu0 %v1749_v42  ;;  %1015 = vmatprep.subr.bf16.mxu1 %v1752_v43 }
  0x48   :  { %975 = vmatpush1.bf16.msra.mxu0 %v1747_v44  ;;  %1016 = vmatpush1.bf16.msra.mxu1 %v1750_v45 }
  0x49   :  { %976 = vmatprep.subr.bf16.mxu0 %v1755_v46  ;;  %1017 = vmatprep.subr.bf16.mxu1 %v1758_v47 }
  0x4c   :  { %977 = vmatpush1.bf16.msra.mxu0 %v1753_v48  ;;  %1018 = vmatpush1.bf16.msra.mxu1 %v1756_v49  ;;  %v1833_v49 = vld [vmem:[#allocation5 + $0xb0] ss:$12 sps:$4 sm:$0xff]  }
  0x4d   :  { %978 = vmatprep.subr.bf16.mxu0 %v1761_v50  ;;  %1019 = vmatprep.subr.bf16.mxu1 %v1764_v51  ;;  %v1834_v50 = vld [vmem:[#allocation5 + $0x230] ss:$12 sps:$4 sm:$0xff]  }
  0x50   :  { %979 = vmatpush1.bf16.msra.mxu0 %v1759_v52  ;;  %1020 = vmatpush1.bf16.msra.mxu1 %v1762_v53 }
  0x51   :  { %980 = vmatprep.subr.bf16.mxu0 %v1767_v54  ;;  %1021 = vmatprep.subr.bf16.mxu1 %v1770_v55  ;;  %v1835_v55 = vld [vmem:[#allocation5 + $0x158] ss:$12 sps:$4 sm:$0xff]  }
  0x54   :  { %981 = vmatpush1.bf16.msra.mxu0 %v1765_v56  ;;  %1022 = vmatpush1.bf16.msra.mxu1 %v1768_v57  ;;  %v1836_v56 = vld [vmem:[#allocation5 + $0x2d8] ss:$12 sps:$4 sm:$0xff]  }
  0x55   :  { %982 = vmatprep.subr.bf16.mxu0 %v1773_v58  ;;  %1023 = vmatprep.subr.bf16.mxu1 %v1776_v59  ;;  %v1837_v57 = vld [vmem:[#allocation5 + $0x98] ss:$12 sps:$4 sm:$0xff]   ;;  %v1839_v59 = vld [vmem:[#allocation5 + $0x140] ss:$12 sps:$4 sm:$0xff]  }
  0x56   :  { %v1838_v58 = vld [vmem:[#allocation5 + $0x218] ss:$12 sps:$4 sm:$0xff]  }
  0x58   :  { %983 = vmatpush1.bf16.msra.mxu0 %v1771_v60  ;;  %1024 = vmatpush1.bf16.msra.mxu1 %v1774_v61  ;;  %v1840_v60 = vld [vmem:[#allocation5 + $0x2c0] ss:$12 sps:$4 sm:$0xff]  }
  0x59   :  { %984 = vmatprep.subr.bf16.mxu0 %v1779_v62  ;;  %1025 = vmatprep.subr.bf16.mxu1 %v1782_v63  ;;  %v1841_v61 = vld [vmem:[#allocation5 + $0x80] ss:$12 sps:$4 sm:$0xff]   ;;  %v1843_v63 = vld [vmem:[#allocation5 + $0x128] ss:$12 sps:$4 sm:$0xff]  }
  0x5a   :  { %v1842_v62 = vld [vmem:[#allocation5 + $0x200] ss:$12 sps:$4 sm:$0xff]  }
  0x5c   :  { %985 = vmatpush1.bf16.msra.mxu0 %v1777_v1  ;;  %1026 = vmatpush1.bf16.msra.mxu1 %v1780_v2  ;;  %v1844_v1 = vld [vmem:[#allocation5 + $0x2a8] ss:$12 sps:$4 sm:$0xff]  }
  0x5d   :  { %986 = vmatprep.subr.bf16.mxu0 %v1785_v3  ;;  %1027 = vmatprep.subr.bf16.mxu1 %v1788_v4  ;;  %v1845_v2 = vld [vmem:[#allocation5 + $0x68] ss:$12 sps:$4 sm:$0xff]   ;;  %v1847_v4 = vld [vmem:[#allocation5 + $0x110] ss:$12 sps:$4 sm:$0xff]  }
  0x5e   :  { %v1846_v3 = vld [vmem:[#allocation5 + $0x1e8] ss:$12 sps:$4 sm:$0xff]  }
  0x60   :  { %987 = vmatpush2.bf16.msra.mxu0 %v1783_v5  ;;  %1028 = vmatpush2.bf16.msra.mxu1 %v1786_v6  ;;  %v1848_v5 = vld [vmem:[#allocation5 + $0x290] ss:$12 sps:$4 sm:$0xff]  }
  0x61   :  { %988 = vmatprep.subr.bf16.mxu0 %v1791_v7  ;;  %1029 = vmatprep.subr.bf16.mxu1 %v1794_v8  ;;  %v1849_v6 = vld [vmem:[#allocation5 + $0x50] ss:$12 sps:$4 sm:$0xff]   ;;  %v1851_v8 = vld [vmem:[#allocation5 + $0xf8] ss:$12 sps:$4 sm:$0xff]  }
  0x62   :  { %v1850_v7 = vld [vmem:[#allocation5 + $0x1d0] ss:$12 sps:$4 sm:$0xff]  }
  0x64   :  { %989 = vmatpush2.bf16.msra.mxu0 %v1789_v9  ;;  %1030 = vmatpush2.bf16.msra.mxu1 %v1792_v10  ;;  %v1852_v9 = vld [vmem:[#allocation5 + $0x278] ss:$12 sps:$4 sm:$0xff]  }
  0x65   :  { %990 = vmatprep.subr.bf16.mxu0 %v1797_v11  ;;  %1031 = vmatprep.subr.bf16.mxu1 %v1800_v12  ;;  %v1853_v10 = vld [vmem:[#allocation5 + $0x38] ss:$12 sps:$4 sm:$0xff]   ;;  %v1855_v12 = vld [vmem:[#allocation5 + $0xe0] ss:$12 sps:$4 sm:$0xff]  }
  0x66   :  { %v1854_v11 = vld [vmem:[#allocation5 + $0x1b8] ss:$12 sps:$4 sm:$0xff]  }
  0x68   :  { %991 = vmatpush2.bf16.msra.mxu0 %v1795_v13  ;;  %1032 = vmatpush2.bf16.msra.mxu1 %v1798_v14  ;;  %v1856_v13 = vld [vmem:[#allocation5 + $0x260] ss:$12 sps:$4 sm:$0xff]  }
  0x69   :  { %992 = vmatprep.subr.bf16.mxu0 %v1803_v15  ;;  %1033 = vmatprep.subr.bf16.mxu1 %v1806_v16  ;;  %v1857_v14 = vld [vmem:[#allocation5 + $0x20] ss:$12 sps:$4 sm:$0xff]   ;;  %v1859_v16 = vld [vmem:[#allocation5 + $0xc8] ss:$12 sps:$4 sm:$0xff]  }
  0x6a   :  { %v1858_v15 = vld [vmem:[#allocation5 + $0x1a0] ss:$12 sps:$4 sm:$0xff]  }
  0x6c   :  { %993 = vmatpush2.bf16.msra.mxu0 %v1801_v17  ;;  %1034 = vmatpush2.bf16.msra.mxu1 %v1804_v18  ;;  %v1860_v17 = vld [vmem:[#allocation5 + $0x248] ss:$12 sps:$4 sm:$0xff]  }
  0x6d   :  { %994 = vmatprep.subr.bf16.mxu0 %v1809_v19  ;;  %1035 = vmatprep.subr.bf16.mxu1 %v1812_v20  ;;  %v1861_v18 = vld [vmem:[#allocation5 + $0x8] ss:$12 sps:$4 sm:$0xff]   ;;  %v1863_v20 = vld [vmem:[%s2094_s3 + $0x78] sm:$0xff]  }
  0x6e   :  { %v1862_v19 = vld [vmem:[#allocation5 + $0x188] ss:$12 sps:$4 sm:$0xff]  }
  0x70   :  { %995 = vmatpush2.bf16.msra.mxu0 %v1807_v21  ;;  %1036 = vmatpush2.bf16.msra.mxu1 %v1810_v22  ;;  %v1864_v21 = vld [vmem:[%s2094_s3 + $0x38] sm:$0xff]   ;;  %v1865_v22 = vld [vmem:[%s2094_s3 + $0x70] sm:$0xff]  }
  0x71   :  { %996 = vmatprep.subr.bf16.mxu0 %v1815_v23  ;;  %1037 = vmatprep.subr.bf16.mxu1 %v1818_v24  ;;  %v1866_v23 = vld [vmem:[%s2094_s3 + $0x30] sm:$0xff]   ;;  %v1867_v24 = vld [vmem:[%s2094_s3 + $0x68] sm:$0xff]  }
  0x74   :  { %997 = vmatpush2.bf16.msra.mxu0 %v1813_v25  ;;  %1038 = vmatpush2.bf16.msra.mxu1 %v1816_v26  ;;  %v1868_v25 = vld [vmem:[%s2094_s3 + $0x28] sm:$0xff]   ;;  %v1869_v26 = vld [vmem:[%s2094_s3 + $0x60] sm:$0xff]  }
  0x75   :  { %998 = vmatprep.subr.bf16.mxu0 %v1821_v27  ;;  %1039 = vmatprep.subr.bf16.mxu1 %v1824_v28  ;;  %v1870_v27 = vld [vmem:[%s2094_s3 + $0x20] sm:$0xff]   ;;  %v1871_v28 = vld [vmem:[%s2094_s3 + $0x58] sm:$0xff]  }
  0x78   :  { %999 = vmatpush2.bf16.msra.mxu0 %v1819_v29  ;;  %1040 = vmatpush2.bf16.msra.mxu1 %v1822_v30  ;;  %v1872_v29 = vld [vmem:[%s2094_s3 + $0x18] sm:$0xff]   ;;  %v1873_v30 = vld [vmem:[%s2094_s3 + $0x50] sm:$0xff]  }
  0x79   :  { %1000 = vmatprep.subr.bf16.mxu0 %v1827_v31  ;;  %1041 = vmatprep.subr.bf16.mxu1 %v1830_v32  ;;  %v1874_v31 = vld [vmem:[%s2094_s3 + $0x10] sm:$0xff]   ;;  %v1875_v32 = vld [vmem:[%s2094_s3 + $0x48] sm:$0xff]  }
  0x7c   :  { %1001 = vmatpush2.bf16.msra.mxu0 %v1825_v33  ;;  %1042 = vmatpush2.bf16.msra.mxu1 %v1828_v34  ;;  %v1876_v33 = vld [vmem:[%s2094_s3 + $0x8] sm:$0xff]   ;;  %v1877_v34 = vld [vmem:[%s2094_s3 + $0x40] sm:$0xff]  }
  0x7d   :  { %1582 = vmatprep.subr.bf16.mxu0 %v1831_v35  ;;  %1604 = vmatprep.subr.bf16.mxu1 %v1832_v36  ;;  %v1878_v35 = vld [vmem:[%s2094_s3] sm:$0xff]   ;;  %v1879_v36 = vld [vmem:[%s2094_s3 + $0xb8] sm:$0xff]  }
  0xff   :  { %v274_v37 = vpop.f32.mrf.mxu0  ;;  %v315_v38 = vpop.f32.mrf.mxu1 }
 0x100   :  { %v322_v39 = vpack.c.bf16 %v274_v37, %v274_v37  ;;  %v324_v40 = vpack.c.bf16 %v315_v38, %v315_v38  ;;  %v1962_v37 = vmov 0.0   ;;  %v1880_v38 = vld [vmem:[%s2094_s3 + $0xb0] sm:$0xff]  }
 0x101   :  { %v276_v41 = vpop.f32.mrf.mxu0  ;;  %v317_v42 = vpop.f32.mrf.mxu1 }
 0x102   :  { %v323_v43 = vpack.c.bf16 %v276_v41, %v276_v41  ;;  %v325_v44 = vpack.c.bf16 %v317_v42, %v317_v42  ;;  %v2004_v51 = vmax.bf16 %v1961_v0, %v322_v39  ;;  %v2007_v52 = vmax.bf16 %v1961_v0, %v324_v40  ;;  %v1881_v39 = vld [vmem:[%s2094_s3 + $0xa8] sm:$0xff]   ;;  %v1882_v40 = vld [vmem:[%s2094_s3 + $0xa0] sm:$0xff]   ;;  %v1883_v41 = vld [vmem:[%s2094_s3 + $0x98] sm:$0xff]  }
 0x103   :  { %v278_v45 = vpop.f32.mrf.mxu0  ;;  %v319_v46 = vpop.f32.mrf.mxu1  ;;  %v1884_v42 = vld [vmem:[%s2094_s3 + $0x90] sm:$0xff]  }
 0x104   :  { %v327_v47 = vmax.bf16 %v1961_v0, %v323_v43  ;;  %v329_v48 = vmax.bf16 %v1961_v0, %v325_v44  ;;  %v1885_v43 = vld [vmem:[%s2094_s3 + $0x88] sm:$0xff]   ;;  %v1886_v44 = vld [vmem:[%s2094_s3 + $0x80] sm:$0xff]   ;;  %s1964_s3 = smov [#allocation7]  }
 0x105   :  { %v279_v53 = vpop.f32.mrf.mxu0  ;;  %v320_v54 = vpop.f32.mrf.mxu1  ;;  %s1420_s21 = sshll.u32 %s1964_s3, 4  ;;  %s1421_s21 = int_to_ptr.vmem [resolvable:$true] %s1420_s21 }
 0x106   :  { %1002 = vmatprep.mubr.bf16.mxu0 %v327_v47  ;;  %1043 = vmatprep.mubr.bf16.mxu1 %v329_v48  ;;  %s1929_s22 = scalar_lea.vmem %s1421_s21, 128  ;;  %p1934_p11 = scmp.lt.s32.totalorder %s1421_s21, %s1421_s21 }
 0x107   :  { %1003 = vmatmul.mubr.bf16.vlgmr.msra.gmra.mxu0 %v2004_v51  ;;  %1044 = vmatmul.mubr.bf16.vlgmr.msra.gmra.mxu1 %v2007_v52  ;;  %p1930_p10 = scmp.ne.s32.totalorder %s1421_s21, %s1929_s22  ;;  %p1935_p12 = scmp.lt.s32.totalorder %s1929_s22, %s1929_s22 }
 0x108   :  { %1583 = vmatpush3.bf16.msra.mxu0 %v1833_v49  ;;  %1605 = vmatpush3.bf16.msra.mxu1 %v1834_v50 }
 0x109   :  { %1084 = vmatprep.mubr.bf16.mxu0 %v327_v47  ;;  %1124 = vmatprep.mubr.bf16.mxu1 %v329_v48  ;;  %p1936_p13 = por %p1935_p12, %p1934_p11 }
 0x10a   :  { %1584 = vmatprep.subr.bf16.mxu0 %v1835_v55  ;;  %1606 = vmatprep.subr.bf16.mxu1 %v1836_v56 }
 0x10b   :  { %p1937_p0 = pnand %p1936_p13, %p1930_p10 }
 0x10c   :  { %1585 = vmatpush3.bf16.msra.mxu0 %v1837_v57  ;;  %1607 = vmatpush3.bf16.msra.mxu1 %v1838_v58 }
 0x10d   :  { %1586 = vmatprep.subr.bf16.mxu0 %v1839_v59  ;;  %1608 = vmatprep.subr.bf16.mxu1 %v1840_v60 }
 0x110   :  { %1587 = vmatpush3.bf16.msra.mxu0 %v1841_v61  ;;  %1609 = vmatpush3.bf16.msra.mxu1 %v1842_v62 }
 0x111   :  { %1588 = vmatprep.subr.bf16.mxu0 %v1843_v63  ;;  %1610 = vmatprep.subr.bf16.mxu1 %v1844_v1 }
 0x114   :  { %1589 = vmatpush3.bf16.msra.mxu0 %v1845_v2  ;;  %1611 = vmatpush3.bf16.msra.mxu1 %v1846_v3 }
 0x115   :  { %1590 = vmatprep.subr.bf16.mxu0 %v1847_v4  ;;  %1612 = vmatprep.subr.bf16.mxu1 %v1848_v5 }
 0x118   :  { %1591 = vmatpush3.bf16.msra.mxu0 %v1849_v6  ;;  %1613 = vmatpush3.bf16.msra.mxu1 %v1850_v7 }
 0x119   :  { %1592 = vmatprep.subr.bf16.mxu0 %v1851_v8  ;;  %1614 = vmatprep.subr.bf16.mxu1 %v1852_v9 }
 0x11c   :  { %1593 = vmatpush3.bf16.msra.mxu0 %v1853_v10  ;;  %1615 = vmatpush3.bf16.msra.mxu1 %v1854_v11 }
 0x11d   :  { %1594 = vmatprep.subr.bf16.mxu0 %v1855_v12  ;;  %1616 = vmatprep.subr.bf16.mxu1 %v1856_v13 }
 0x120   :  { %1595 = vmatpush3.bf16.msra.mxu0 %v1857_v14  ;;  %1617 = vmatpush3.bf16.msra.mxu1 %v1858_v15 }
 0x121   :  { %1596 = vmatprep.subr.bf16.mxu0 %v1859_v16  ;;  %1618 = vmatprep.subr.bf16.mxu1 %v1860_v17 }
 0x124   :  { %1597 = vmatpush3.bf16.msra.mxu0 %v1861_v18  ;;  %1619 = vmatpush3.bf16.msra.mxu1 %v1862_v19 }
 0x125   :  { %1626 = vmatprep.subr.bf16.mxu0 %v1863_v20  ;;  %1657 = vmatprep.subr.bf16.mxu1 %v1962_v37 }
 0x127   :  { %1085 = vmatmul.mubr.bf16.vlgmr.msra.gmra.mxu0 %v2004_v51  ;;  %1125 = vmatmul.mubr.bf16.vlgmr.msra.gmra.mxu1 %v2007_v52 }
 0x128   :  { %1627 = vmatpush3.bf16.msra.mxu0 %v1864_v21  ;;  %1658 = vmatpush3.bf16.msra.mxu1 %v1879_v36 }
 0x129   :  { %1628 = vmatprep.subr.bf16.mxu0 %v1865_v22  ;;  %1659 = vmatprep.subr.bf16.mxu1 %v1962_v37 }
 0x12a   :  { %1673 = vmatprep.mubr.msk.bf16.mxu1 %vm1963_vm0, %v1962_v37 }
 0x12c   :  { %1629 = vmatpush3.bf16.msra.mxu0 %v1866_v23  ;;  %1660 = vmatpush3.bf16.msra.mxu1 %v1880_v38 }
 0x12d   :  { %1630 = vmatprep.subr.bf16.mxu0 %v1867_v24  ;;  %1661 = vmatprep.subr.bf16.mxu1 %v1962_v37 }
 0x130   :  { %1631 = vmatpush3.bf16.msra.mxu0 %v1868_v25  ;;  %1662 = vmatpush3.bf16.msra.mxu1 %v1881_v39 }
 0x131   :  { %1632 = vmatprep.subr.bf16.mxu0 %v1869_v26  ;;  %1663 = vmatprep.subr.bf16.mxu1 %v1962_v37 }
 0x134   :  { %1633 = vmatpush3.bf16.msra.mxu0 %v1870_v27  ;;  %1664 = vmatpush3.bf16.msra.mxu1 %v1882_v40 }
 0x135   :  { %1634 = vmatprep.subr.bf16.mxu0 %v1871_v28  ;;  %1665 = vmatprep.subr.bf16.mxu1 %v1962_v37 }
 0x138   :  { %1635 = vmatpush3.bf16.msra.mxu0 %v1872_v29  ;;  %1666 = vmatpush3.bf16.msra.mxu1 %v1883_v41 }
 0x139   :  { %1636 = vmatprep.subr.bf16.mxu0 %v1873_v30  ;;  %1667 = vmatprep.subr.bf16.mxu1 %v1962_v37 }
 0x13c   :  { %1637 = vmatpush3.bf16.msra.mxu0 %v1874_v31  ;;  %1668 = vmatpush3.bf16.msra.mxu1 %v1884_v42 }
 0x13d   :  { %1638 = vmatprep.subr.bf16.mxu0 %v1875_v32  ;;  %1669 = vmatprep.subr.bf16.mxu1 %v1962_v37 }
 0x140   :  { %1639 = vmatpush3.bf16.msra.mxu0 %v1876_v33  ;;  %1670 = vmatpush3.bf16.msra.mxu1 %v1885_v43 }
 0x141   :  { %1640 = vmatprep.subr.bf16.mxu0 %v1877_v34  ;;  %1671 = vmatprep.subr.bf16.mxu1 %v1962_v37 }
 0x144   :  { %1641 = vmatpush3.bf16.msra.mxu0 %v1878_v35  ;;  %1672 = vmatpush3.bf16.msra.mxu1 %v1886_v44 }
 0x1c7   :  { %v1004_v45 = vpop.f32.mrf.mxu0  ;;  %v1045_v46 = vpop.f32.mrf.mxu1 }
 0x1c8   :  { %v1046_v47 = vadd.f32 %v1045_v46, %v1004_v45 }
 0x1c9   :  { %v1006_v48 = vpop.f32.mrf.mxu0  ;;  %v1047_v49 = vpop.f32.mrf.mxu1 }
 0x1ca   :  { %v1048_v50 = vadd.f32 %v1047_v49, %v1006_v48  ;;  %v1132_v51 = vpack.c.bf16 %v1046_v47, %v1046_v47 }
 0x1cb   :  { %v1008_v52 = vpop.f32.mrf.mxu0  ;;  %v1049_v53 = vpop.f32.mrf.mxu1 }
 0x1cc   :  { %v1133_v54 = vpack.c.bf16 %v1048_v50, %v1048_v50  ;;  %v1135_v58 = vmax.bf16 %v1961_v0, %v1132_v51 }
 0x1cd   :  { %v1009_v55 = vpop.f32.mrf.mxu0  ;;  %v1050_v56 = vpop.f32.mrf.mxu1 }
 0x1ce   :  { %v1136_v57 = vmax.bf16 %v1961_v0, %v1133_v54 }
 0x1d0   :  { %1362 = vmatprep.mubr.bf16.mxu0 %v1136_v57 }
 0x1d1   :  { %1363 = vmatmul.mubr.bf16.vlgmr.msra.gmra.mxu0 %v1135_v58 }
 0x1e7   :  { %v1598_v59 = vpop.f32.mrf.mxu0  ;;  %v1620_v60 = vpop.f32.mrf.mxu1 }
 0x1e9   :  { %v1599_v61 = vpop.f32.mrf.mxu0  ;;  %v1621_v62 = vpop.f32.mrf.mxu1 }
 0x1ea   :  { %v1600_v63 = vadd.f32 %v1599_v61, %v1598_v59  ;;  %v1622_v1 = vadd.f32 %v1621_v62, %v1620_v60 }
 0x1eb   :  { %v1601_v2 = vpop.f32.mrf.mxu0  ;;  %v1623_v3 = vpop.f32.mrf.mxu1 }
 0x1ec   :  { %v1127_v4 = vadd.f32 %v1622_v1, %v1600_v63 }
 0x1ed   :  { %v1602_v5 = vpop.f32.mrf.mxu0  ;;  %v1624_v6 = vpop.f32.mrf.mxu1 }
 0x1ee   :  { %v1134_v7 = vpack.c.bf16 %v1127_v4, %v1127_v4 }
 0x1f0   :  { %v1137_v8 = vmax.bf16 %v1961_v0, %v1134_v7 }
 0x1f2   :  { %1674 = vmatmul.mubr.bf16.vlgmr.msra.gmra.mxu1 %v1137_v8 }
 0x291   :  { %v1642_v9 = vpop.f32.mrf.mxu0 }
 0x293   :  { %v1643_v10 = vpop.f32.mrf.mxu0 }
 0x294   :  { %v1644_v13 = vadd.f32 %v1643_v10, %v1642_v9 }
 0x295   :  { %v1645_v11 = vpop.f32.mrf.mxu0 }
 0x297   :  { %v1646_v12 = vpop.f32.mrf.mxu0 }
 0x2b2   :  { %v1404_v14 = vpop.f32.mrf.mxu1 }
 0x2b3   :  { %v1405_v15 = vadd.f32 %v1644_v13, %v1404_v14 }
 0x2b4   :  { %v1675_v16 = vpop.f32.mrf.mxu1 }
 0x2b5   :  { %1887 = vtanh.f32 %v1405_v15 }
 0x2b6   :  { %v1407_v17 = vpop.f32.mrf.mxu1 }
 0x2b8   :  { %v1676_v18 = vpop.f32.mrf.mxu1 }
 0x2c2   :  { %v1888_v19 = vpop.eup %1887 }
 0x2c3   :  { %v1411_v20 = vadd.f32 1.0, %v1888_v19 }
 0x2c5   :  { %1413 = vst.msk [vmem:[#allocation7] sm:$0xff] %vm1412_vm1, %v1411_v20 }
 0x2c6   :  { %1940 = shalt.err (!%p1937_p0)
}
 0x2c7   :  { %1423 = dma.vmem_to_hbm [thread:$0]  %s1421_s21, 128, %s2095_s4, [#allocation4]  }
 0x2c8   :  { %1953 = dma.done.wait [#allocation4], 128  }
 0x2c9   :  { %1954 = vsyncadd [#allocation4], 4294967168 }
 0x2ca   :  { %1427 = vsyncpa [#allocation3], 1 }
 0x2cb   :  { %1428 = vsyncpa [#allocation6], 1 }
 0x2cc   :  { %1429 = vsyncpa [#allocation4], 1 }

</bundles_post_ra>
